<compile_context>
chip_gen: v6e
topology: v6e:2x2x1
jax: 0.10.0
libtpu: 0.0.40
codegen_flags: <defaults>
</compile_context>

<pallas_src>
import functools
from itertools import combinations

import jax
import jax.numpy as jnp
import numpy as np
from jax.experimental import pallas as pl
from jax.experimental.pallas import tpu as pltpu


def _round_up(x, m):
    return ((x + m - 1) // m) * m


def _ocl_tile_kernel(ei_ref, ej_ref, sqi_ref, sqj_ref, li_ref, lj_ref, out_ref,
                     *, margin, valid_n, tm, tn):
    # ei_ref: [TM, D] f32   ej_ref: [TN, D] f32
    # sqi_ref: [TM, 1] f32  sqj_ref: [1, TN] f32   (precomputed ||e||^2 views)
    # li_ref:  [TM, 1] i32  lj_ref:  [1, TN] i32   (label column / row views)
    # out_ref: [1, 8, 128] f32 -- per-i-block partial-sum slab, resident over j.
    i = pl.program_id(0)
    j = pl.program_id(1)

    @pl.when(j == 0)
    def _init():
        out_ref[...] = jnp.zeros_like(out_ref)

    # Only upper-triangular tile pairs contribute (symmetry -> ~2x less work).
    @pl.when(j >= i)
    def _compute():
        ei = ei_ref[...].astype(jnp.float32)
        ej = ej_ref[...].astype(jnp.float32)

        # Gram tile on the MXU, f32 accumulation; contraction over D of both
        # operands avoids an explicit in-kernel transpose of ej.
        gram = jax.lax.dot_general(
            ei, ej,
            dimension_numbers=(((1,), (1,)), ((), ())),
            preferred_element_type=jnp.float32)                    # [TM, TN]

        dist2 = sqi_ref[...] + sqj_ref[...] - 2.0 * gram
        dist2 = jnp.maximum(dist2, 0.0)                            # guard

        # Global (row, col) indices: strict upper triangle + padding mask.
        row = i * tm + jax.lax.broadcasted_iota(jnp.int32, (tm, tn), 0)
        col = j * tn + jax.lax.broadcasted_iota(jnp.int32, (tm, tn), 1)
        pair_ok = jnp.logical_and(row < col, col < valid_n)

        same = li_ref[...] == lj_ref[...]                          # [TM, TN]

        # positive: ||e_i - e_j||^2 ; negative: relu(margin - ||e_i - e_j||)^2
        hinge = jnp.maximum(margin - jnp.sqrt(dist2), 0.0)
        contrib = jnp.where(same, dist2, hinge * hinge)

        tile_sum = jnp.sum(jnp.where(pair_ok, contrib, 0.0))       # scalar
        out_ref[...] += tile_sum


def online_contrastive_loss(embeddings, labels, margin, *, tile=256):
    """embeddings: [B, D] float, labels: [B] int, margin: python float.

    `tile` is the square tile edge of the pairwise matrix. Keep <= ~1024 on
    v7x (64 MiB VMEM); 256 is a safe default on all generations.
    """
    embeddings = jnp.asarray(embeddings, jnp.float32)
    labels = jnp.asarray(labels, jnp.int32)
    B, D = embeddings.shape

    if B <= tile:
        B_pad = _round_up(B, 8)          # single tile per axis
        TM = TN = B_pad
    else:
        TM = TN = tile                   # must be a multiple of 128
        B_pad = _round_up(B, tile)

    pad = B_pad - B
    emb = jnp.pad(embeddings, ((0, pad), (0, 0))) if pad else embeddings
    lbl = jnp.pad(labels, (0, pad), constant_values=-1) if pad else labels

    # Precompute squared norms / label views once (lane-dense row forms plus
    # column forms) so the kernel does no transposes or redundant reductions.
    sq = jnp.sum(emb * emb, axis=1)
    sq_col = sq.reshape(B_pad, 1)
    sq_row = sq.reshape(1, B_pad)
    lbl_col = lbl.reshape(B_pad, 1)
    lbl_row = lbl.reshape(1, B_pad)

    n_i = B_pad // TM
    n_j = B_pad // TN
    n_pairs = B * (B - 1) // 2           # AllPositivePairSelector (unbalanced)

    kernel = functools.partial(
        _ocl_tile_kernel, margin=float(margin), valid_n=B, tm=TM, tn=TN)

    n_tri_tiles = n_i * (n_j + 1) // 2   # tiles actually computed
    cost = pl.CostEstimate(
        flops=int((2 * TM * TN * D + 10 * TM * TN) * n_tri_tiles),
        transcendentals=int(TM * TN * n_tri_tiles),
        bytes_accessed=int(4 * (TM * D + TN * D + 2 * TM + 2 * TN) * n_i * n_j
                           + 4 * n_i * 8 * 128),
    )

    partials = pl.pallas_call(
        kernel,
        out_shape=jax.ShapeDtypeStruct((n_i, 8, 128), jnp.float32),
        grid=(n_i, n_j),
        in_specs=[
            pl.BlockSpec((TM, D), lambda i, j: (i, 0)),   # i-row slab of E
            pl.BlockSpec((TN, D), lambda i, j: (j, 0)),   # j-row slab of E
            pl.BlockSpec((TM, 1), lambda i, j: (i, 0)),   # ||e||^2 column view
            pl.BlockSpec((1, TN), lambda i, j: (0, j)),   # ||e||^2 row view
            pl.BlockSpec((TM, 1), lambda i, j: (i, 0)),   # labels column view
            pl.BlockSpec((1, TN), lambda i, j: (0, j)),   # labels row view
        ],
        out_specs=pl.BlockSpec((1, 8, 128), lambda i, j: (i, 0, 0)),
        compiler_params=pltpu.CompilerParams(
            dimension_semantics=("parallel", "arbitrary"),
            vmem_limit_bytes=48 * 1024 * 1024,
        ),
        cost_estimate=cost,
    )(emb, emb, sq_col, sq_row, lbl_col, lbl_row)

    # Each i-block's partial sum is broadcast over its (8,128) slab; pick [0,0].
    total = jnp.sum(partials[:, 0, 0])
    return total / jnp.float32(n_pairs)


def _reference(embeddings, labels, margin):
    """Mirrors the PyTorch forward exactly (explicit pair index lists)."""
    e = np.asarray(embeddings, dtype=np.float32)
    y = np.asarray(labels)
    all_pairs = np.array(list(combinations(range(len(y)), 2)))
    pos = all_pairs[y[all_pairs[:, 0]] == y[all_pairs[:, 1]]]
    neg = all_pairs[y[all_pairs[:, 0]] != y[all_pairs[:, 1]]]
    pos_loss = ((e[pos[:, 0]] - e[pos[:, 1]]) ** 2).sum(1)
    neg_d = np.sqrt(((e[neg[:, 0]] - e[neg[:, 1]]) ** 2).sum(1))
    neg_loss = np.maximum(margin - neg_d, 0.0) ** 2
    return np.concatenate([pos_loss, neg_loss], axis=0).mean()


if __name__ == "__main__":
    margin = 1.0
    key = jax.random.PRNGKey(0)

    # Case 1: small batch, single tile (matches the module's toy usage).
    B, D = 8, 32
    k1, k2, k3 = jax.random.split(key, 3)
    emb1 = 0.1 * jax.random.normal(k1, (B, D), dtype=jnp.float32)
    lbl1 = jnp.array([0, 0, 0, 0, 1, 1, 1, 1], dtype=jnp.int32)
    out1 = jax.block_until_ready(online_contrastive_loss(emb1, lbl1, margin))
    ref1 = _reference(np.asarray(emb1), np.asarray(lbl1), margin)
    np.testing.assert_allclose(np.asarray(out1), ref1, rtol=1e-4, atol=1e-6)

    # Case 2: batch not a multiple of 8 -> exercises padding mask.
    B2 = 20
    emb2 = 0.1 * jax.random.normal(k2, (B2, D), dtype=jnp.float32)
    lbl2 = jax.random.randint(k2, (B2,), 0, 3, dtype=jnp.int32)
    out2 = jax.block_until_ready(online_contrastive_loss(emb2, lbl2, margin))
    ref2 = _reference(np.asarray(emb2), np.asarray(lbl2), margin)
    np.testing.assert_allclose(np.asarray(out2), ref2, rtol=1e-4, atol=1e-6)

    # Case 3: multi-tile grid (tile=128, B=200 -> 2x2 tiles, lower-tri skipped).
    B3 = 200
    emb3 = 0.1 * jax.random.normal(k3, (B3, D), dtype=jnp.float32)
    lbl3 = jax.random.randint(k3, (B3,), 0, 4, dtype=jnp.int32)
    out3 = jax.block_until_ready(
        online_contrastive_loss(emb3, lbl3, margin, tile=128))
    ref3 = _reference(np.asarray(emb3), np.asarray(lbl3), margin)
    np.testing.assert_allclose(np.asarray(out3), ref3, rtol=1e-4, atol=1e-6)

    print("KERNEL_OK")
</pallas_src>

<mosaic_0001>
module attributes {stable_mosaic.version = 11 : i64} {
  func.func @_ocl_tile_kernel(%arg0: i32, %arg1: i32, %arg2: memref<8x32xf32, #tpu.memory_space<vmem>>, %arg3: memref<8x32xf32, #tpu.memory_space<vmem>>, %arg4: memref<8x1xf32, #tpu.memory_space<vmem>>, %arg5: memref<1x8xf32, #tpu.memory_space<vmem>>, %arg6: memref<8x1xi32, #tpu.memory_space<vmem>>, %arg7: memref<1x8xi32, #tpu.memory_space<vmem>>, %arg8: memref<1x8x128xf32, #tpu.memory_space<vmem>>) attributes {dimension_semantics = [#tpu.dimension_semantics<parallel>, #tpu.dimension_semantics<arbitrary>], iteration_bounds = array<i64: 1, 1>, scalar_prefetch = 0 : i64, scratch_operands = 0 : i64, tpu.core_type = #tpu.core_type<tc>, window_params = [{transform_indices = @transform_0, window_bounds = array<i64: 8, 32>}, {transform_indices = @transform_1, window_bounds = array<i64: 8, 32>}, {transform_indices = @transform_2, window_bounds = array<i64: 8, 1>}, {transform_indices = @transform_3, window_bounds = array<i64: 1, 8>}, {transform_indices = @transform_4, window_bounds = array<i64: 8, 1>}, {transform_indices = @transform_5, window_bounds = array<i64: 1, 8>}, {transform_indices = @transform_6, window_bounds = array<i64: 1, 8, 128>}]} {
    %c0_i32 = arith.constant 0 : i32
    %0 = arith.cmpi eq, %arg1, %c0_i32 : i32
    %1 = arith.extui %0 : i1 to i32
    %c0_i32_0 = arith.constant 0 : i32
    %2 = arith.cmpi ne, %1, %c0_i32_0 : i32
    scf.if %2 {
      %cst = arith.constant 0.000000e+00 : f32
      %6 = vector.broadcast %cst : f32 to vector<1x8x128xf32>
      %c0 = arith.constant 0 : index
      %c0_2 = arith.constant 0 : index
      %c0_3 = arith.constant 0 : index
      %7 = vector.load %arg8[%c0, %c0_2, %c0_3] : memref<1x8x128xf32, #tpu.memory_space<vmem>>, vector<1x8x128xf32>
      tpu.vector_store %arg8[%c0, %c0_2, %c0_3], %6 {strides = array<i32>} : memref<1x8x128xf32, #tpu.memory_space<vmem>>, vector<1x8x128xf32>,
    } else {
    }
    %3 = arith.cmpi sge, %arg1, %arg0 : i32
    %4 = arith.extui %3 : i1 to i32
    %c0_i32_1 = arith.constant 0 : i32
    %5 = arith.cmpi ne, %4, %c0_i32_1 : i32
    scf.if %5 {
      %c0 = arith.constant 0 : index
      %c0_2 = arith.constant 0 : index
      %6 = vector.load %arg2[%c0, %c0_2] : memref<8x32xf32, #tpu.memory_space<vmem>>, vector<8x32xf32>
      %c0_3 = arith.constant 0 : index
      %c0_4 = arith.constant 0 : index
      %7 = vector.load %arg3[%c0_3, %c0_4] : memref<8x32xf32, #tpu.memory_space<vmem>>, vector<8x32xf32>
      %cst = arith.constant dense<0.000000e+00> : vector<8x8xf32>
      %8 = tpu.matmul %6, %7, %cst {dimension_numbers = #tpu.dot_dimension_numbers<[1], [1], [0], [0], [0, 0, 1, 0], [], []>} : vector<8x32xf32>, vector<8x32xf32>, vector<8x8xf32> -> vector<8x8xf32>
      %c0_5 = arith.constant 0 : index
      %c0_6 = arith.constant 0 : index
      %9 = vector.load %arg4[%c0_5, %c0_6] : memref<8x1xf32, #tpu.memory_space<vmem>>, vector<8x1xf32>
      %c0_7 = arith.constant 0 : index
      %c0_8 = arith.constant 0 : index
      %10 = vector.load %arg5[%c0_7, %c0_8] : memref<1x8xf32, #tpu.memory_space<vmem>>, vector<1x8xf32>
      %11 = vector.broadcast %9 : vector<8x1xf32> to vector<8x8xf32>
      %12 = vector.broadcast %10 : vector<1x8xf32> to vector<8x8xf32>
      %13 = arith.addf %11, %12 : vector<8x8xf32>
      %cst_9 = arith.constant 2.000000e+00 : f32
      %14 = vector.broadcast %cst_9 : f32 to vector<8x8xf32>
      %15 = arith.mulf %14, %8 : vector<8x8xf32>
      %16 = arith.subf %13, %15 : vector<8x8xf32>
      %cst_10 = arith.constant 0.000000e+00 : f32
      %17 = vector.broadcast %cst_10 : f32 to vector<8x8xf32>
      %18 = arith.maximumf %16, %17 : vector<8x8xf32>
      %c8_i32 = arith.constant 8 : i32
      %19 = arith.muli %arg0, %c8_i32 : i32
      %20 = tpu.iota {dimensions = array<i32: 0>} : vector<8x8xi32>
      %21 = vector.broadcast %19 : i32 to vector<8x8xi32>
      %22 = arith.addi %21, %20 : vector<8x8xi32>
      %c8_i32_11 = arith.constant 8 : i32
      %23 = arith.muli %arg1, %c8_i32_11 : i32
      %24 = tpu.iota {dimensions = array<i32: 1>} : vector<8x8xi32>
      %25 = vector.broadcast %23 : i32 to vector<8x8xi32>
      %26 = arith.addi %25, %24 : vector<8x8xi32>
      %27 = arith.cmpi slt, %22, %26 : vector<8x8xi32>
      %c8_i32_12 = arith.constant 8 : i32
      %28 = vector.broadcast %c8_i32_12 : i32 to vector<8x8xi32>
      %29 = arith.cmpi slt, %26, %28 : vector<8x8xi32>
      %30 = arith.andi %27, %29 : vector<8x8xi1>
      %c0_13 = arith.constant 0 : index
      %c0_14 = arith.constant 0 : index
      %31 = vector.load %arg6[%c0_13, %c0_14] : memref<8x1xi32, #tpu.memory_space<vmem>>, vector<8x1xi32>
      %c0_15 = arith.constant 0 : index
      %c0_16 = arith.constant 0 : index
      %32 = vector.load %arg7[%c0_15, %c0_16] : memref<1x8xi32, #tpu.memory_space<vmem>>, vector<1x8xi32>
      %33 = vector.broadcast %31 : vector<8x1xi32> to vector<8x8xi32>
      %34 = vector.broadcast %32 : vector<1x8xi32> to vector<8x8xi32>
      %35 = arith.cmpi eq, %33, %34 : vector<8x8xi32>
      %36 = math.sqrt %18 : vector<8x8xf32>
      %cst_17 = arith.constant 1.000000e+00 : f32
      %37 = vector.broadcast %cst_17 : f32 to vector<8x8xf32>
      %38 = arith.subf %37, %36 : vector<8x8xf32>
      %cst_18 = arith.constant 0.000000e+00 : f32
      %39 = vector.broadcast %cst_18 : f32 to vector<8x8xf32>
      %40 = arith.maximumf %38, %39 : vector<8x8xf32>
      %41 = arith.mulf %40, %40 : vector<8x8xf32>
      %42 = arith.select %35, %18, %41 : vector<8x8xi1>, vector<8x8xf32>
      %cst_19 = arith.constant 0.000000e+00 : f32
      %43 = vector.broadcast %cst_19 : f32 to vector<8x8xf32>
      %44 = arith.select %30, %42, %43 : vector<8x8xi1>, vector<8x8xf32>
      %45 = vector.shape_cast %44 : vector<8x8xf32> to vector<1x8x8xf32>
      %cst_20 = arith.constant dense<0.000000e+00> : vector<1xf32>
      %46 = vector.multi_reduction <add>, %45, %cst_20 [1, 2] : vector<1x8x8xf32> to vector<1xf32>
      %47 = vector.shape_cast %46 : vector<1xf32> to vector<1x1x1xf32>
      %48 = vector.extract %47[0, 0, 0] : f32 from vector<1x1x1xf32>
      %c0_21 = arith.constant 0 : index
      %c0_22 = arith.constant 0 : index
      %c0_23 = arith.constant 0 : index
      %49 = vector.load %arg8[%c0_21, %c0_22, %c0_23] : memref<1x8x128xf32, #tpu.memory_space<vmem>>, vector<1x8x128xf32>
      %50 = vector.broadcast %48 : f32 to vector<1x8x128xf32>
      %51 = arith.addf %49, %50 : vector<1x8x128xf32>
      %c0_24 = arith.constant 0 : index
      %c0_25 = arith.constant 0 : index
      %c0_26 = arith.constant 0 : index
      %52 = vector.load %arg8[%c0_24, %c0_25, %c0_26] : memref<1x8x128xf32, #tpu.memory_space<vmem>>, vector<1x8x128xf32>
      tpu.vector_store %arg8[%c0_24, %c0_25, %c0_26], %51 {strides = array<i32>} : memref<1x8x128xf32, #tpu.memory_space<vmem>>, vector<1x8x128xf32>,
    } else {
    }
    return
  }
  func.func @transform_0(%arg0: i32, %arg1: i32) -> (i32, i32) {
    %c0_i32 = arith.constant 0 : i32
    %c0_i32_0 = arith.constant 0 : i32
    return %arg0, %c0_i32 : i32, i32
  }
  func.func @transform_1(%arg0: i32, %arg1: i32) -> (i32, i32) {
    %c0_i32 = arith.constant 0 : i32
    %c0_i32_0 = arith.constant 0 : i32
    return %arg1, %c0_i32 : i32, i32
  }
  func.func @transform_2(%arg0: i32, %arg1: i32) -> (i32, i32) {
    %c0_i32 = arith.constant 0 : i32
    %c0_i32_0 = arith.constant 0 : i32
    return %arg0, %c0_i32 : i32, i32
  }
  func.func @transform_3(%arg0: i32, %arg1: i32) -> (i32, i32) {
    %c0_i32 = arith.constant 0 : i32
    %c0_i32_0 = arith.constant 0 : i32
    return %c0_i32, %arg1 : i32, i32
  }
  func.func @transform_4(%arg0: i32, %arg1: i32) -> (i32, i32) {
    %c0_i32 = arith.constant 0 : i32
    %c0_i32_0 = arith.constant 0 : i32
    return %arg0, %c0_i32 : i32, i32
  }
  func.func @transform_5(%arg0: i32, %arg1: i32) -> (i32, i32) {
    %c0_i32 = arith.constant 0 : i32
    %c0_i32_0 = arith.constant 0 : i32
    return %c0_i32, %arg1 : i32, i32
  }
  func.func @transform_6(%arg0: i32, %arg1: i32) -> (i32, i32, i32) {
    %c0_i32 = arith.constant 0 : i32
    %c0_i32_0 = arith.constant 0 : i32
    %c0_i32_1 = arith.constant 0 : i32
    return %arg0, %c0_i32, %c0_i32_0 : i32, i32, i32
  }
}

</mosaic_0001>

<bundles_post_ra>
// kernel: tpu_custom_call.1
= control target key start
LH: loop header
LB: loop body
LE: loop exit
PB: predicated region body
PF: predicated region fallthrough
CT: control target
= control target key end

     0   :  { %vm35_vm0 = vcmask 261120   ;;  %v235_v1 = vmov 0.0   ;;  %vm236_vm1 = vmmov 0   ;;  %v237_v4 = vmov 0   ;;  %s295_s0 = inlined_call_operand.vmem [shape: f32[8,32], index: 0, kind: input, shape index: {}]   ;;  %s296_s1 = inlined_call_operand.vmem [shape: f32[8,32], index: 1, kind: input, shape index: {}]   ;;  %s297_s2 = inlined_call_operand.vmem [shape: f32[8,1], index: 2, kind: input, shape index: {}]   ;;  %s298_s3 = inlined_call_operand.vmem [shape: f32[1,8], index: 3, kind: input, shape index: {}]   ;;  %s299_s4 = inlined_call_operand.vmem [shape: s32[8,1], index: 4, kind: input, shape index: {}]   ;;  %s300_s5 = inlined_call_operand.vmem [shape: s32[1,8], index: 5, kind: input, shape index: {}]   ;;  %s301_s6 = inlined_call_operand.hbm [shape: f32[1,8,128], index: 6, kind: output, shape index: {}]  }
   0x1   :  { %v34_v0 = vld [vmem:[%s296_s1] sm:$0xff]  ;;  %199 = vmatprep.subr.mxu0 %v235_v1  ;;  %201 = vmatprep.mubr.msk.f32.mxu0 %vm236_vm1, %v235_v1 }
   0x2   :  { %v112_v2 = vld [vmem:[%s297_s2] sm:$0xff]  ;;  %200 = vmatpush3.xpose.msk.msra.mxu0 %vm35_vm0, %v34_v0  ;;  %210 = vset.pattern.permute.xlu0 %v237_v4 }
   0x3   :  { %v33_v3 = vld [vmem:[%s295_s0] sm:$0xff] }
   0x4   :  { %11 = vsyncpa [#allocation3], 0  ;;  %116 = vperm.xlu0 %210, %v112_v2   ;;  %v142_v5 = vld [vmem:[%s299_s4] sm:$0xff]  ;;  %v130_v14 = vlaneseq  ;;  %vm164_vm8 = vcmask 64512  }
   0x5   :  { %202 = vmatmul.mubr.msk.f32.vlgmr.msra.gmra.mxu0 %vm35_vm0, %v33_v3  ;;  %v195_v6 = vld [vmem:[%s298_s3] ss:$0 sm:$0xff]  ;;  %s238_s3 = smov [#allocation2]  }
   0x6   :  { %v131_v17 = vshrl.u32 %v130_v14, 7  ;;  %v136_v18 = vand.u32 127, %v130_v14  ;;  %v196_v23 = vld [vmem:[%s300_s5] ss:$0 sm:$0xff]  ;;  %s185_s4 = sshll.u32 %s238_s3, 4  ;;  %s186_s4 = int_to_ptr.vmem [resolvable:$true] %s185_s4 }
   0x7   :  { %s213_s30 = scalar_lea.vmem %s186_s4, 128  ;;  %p218_p1 = scmp.lt.s32.totalorder %s186_s4, %s186_s4 }
   0x8   :  { %145 = vperm.xlu0 %210, %v142_v5   ;;  %vm139_vm4 = vcmp.lt.s32.totalorder %v131_v17, %v136_v18  ;;  %vm140_vm5 = vcmp.lt.s32.totalorder %v136_v18, 8  ;;  %p214_p0 = scmp.ne.s32.totalorder %s186_s4, %s213_s30  ;;  %p219_p2 = scmp.lt.s32.totalorder %s213_s30, %s213_s30 }
   0x9   :  { %vm141_vm6 = vmand %vm139_vm4, %vm140_vm5 }
   0xa   :  { %p220_p3 = por %p219_p2, %p218_p1 }
   0xc   :  { %p221_p4 = pnand %p220_p3, %p214_p0 }
  0x7f   :  { %v117_v7 = vpop.permute.xlu0 %116 }
  0x80   :  { %v125_v8 = vadd.f32 %v195_v6, %v117_v7 }
  0x83   :  { %v146_v24 = vpop.permute.xlu0 %145 }
  0x84   :  { %vm151_vm7 = vcmp.eq.s32.totalorder %v146_v24, %v196_v23 }
  0xc5   :  { %v108_v9 = vpop.f32.mrf.mxu0 }
  0xc6   :  { %v126_v10 = vmul.f32 2.0, %v108_v9 }
  0xc7   :  { %v203_v11 = vpop.f32.mrf.mxu0 }
  0xc8   :  { %v127_v12 = vsub.f32 %v125_v8, %v126_v10 }
  0xca   :  { %v128_v13 = vmax.f32 %v127_v12, 0.0 }
  0xcc   :  { %211 = vrsqrt.f32 %v128_v13  ;;  %vm154_vm2 = vcmp.eq.f32.partialorder %v128_v13, inf  ;;  %v157_v19 = vand.u32 2147483648, %v128_v13  ;;  %vm156_vm3 = vcmp.eq.f32.partialorder %v128_v13, 0.0 }
  0xd9   :  { %v212_v15 = vpop.eup %211 }
  0xda   :  { %v153_v16 = vmul.f32 %v212_v15, %v128_v13 }
  0xdc   :  { %v155_v20 = vsel %vm154_vm2, %v128_v13, %v153_v16 }
  0xdd   :  { %v158_v21 = vsel %vm156_vm3, %v157_v19, %v155_v20 }
  0xde   :  { %v159_v22 = vsub.f32 1.0, %v158_v21 }
  0xe0   :  { %v160_v25 = vmax.f32 %v159_v22, 0.0 }
  0xe2   :  { %v161_v26 = vmul.f32 %v160_v25, %v160_v25 }
  0xe4   :  { %v162_v27 = vsel %vm151_vm7, %v128_v13, %v161_v26 }
  0xe5   :  { %v163_v28 = vsel %vm141_vm6, %v162_v27, 0.0 }
  0xe6   :  { %v165_v29 = vsel %vm164_vm8, %v163_v28, 0.0 }
  0xe7   :  { %166 = vadd.xlane.f32.xlu1 %v165_v29 }
 0x170   :  { %v167_v30 = vpop.xlane.xlu1 %166 }
 0x171   :  { %v168_v31 = vrot.slane %v167_v30, 4 }
 0x173   :  { %v169_v32 = vadd.f32 %v168_v31, %v167_v30 }
 0x175   :  { %v170_v33 = vrot.slane %v169_v32, 2 }
 0x177   :  { %v171_v34 = vadd.f32 %v170_v33, %v169_v32 }
 0x179   :  { %v172_v35 = vrot.slane %v171_v34, 1 }
 0x17b   :  { %v173_v36 = vadd.f32 %v172_v35, %v171_v34 }
 0x17d   :  { %204 = vpush %v173_v36 }
 0x1ae   :  { %s205_s5 = spop %204 }
 0x1af   :  { %v176_v37 = vstv %s205_s5 }
 0x1b0   :  { %178 = vst [vmem:[#allocation2] sm:$0xff] %v176_v37 }
 0x1b1   :  { %224 = shalt.err (!%p221_p4)
}
 0x1b2   :  { %188 = dma.vmem_to_hbm [thread:$0]  %s186_s4, 128, %s301_s6, [#allocation3]  }
 0x1b3   :  { %233 = dma.done.wait [#allocation3], 128  }
 0x1b4   :  { %234 = vsyncadd [#allocation3], 4294967168 }
 0x1b5   :  { %192 = vsyncpa [#allocation3], 1 }

</bundles_post_ra>
